<compile_context>
chip_gen: v7x
topology: tpu7x:2x2x1
jax: 0.10.0
libtpu: 0.0.40
codegen_flags: <defaults>
</compile_context>

<pallas_src>
import math
import functools

import jax
import jax.numpy as jnp
from jax import lax
from jax.experimental import pallas as pl
from jax.experimental.pallas import tpu as pltpu


def _mha_flash_kernel(q_ref, k_ref, v_ref, wo_ref, bo_ref,
                      out_ref,
                      acc_out, m_sc, l_sc, acc_ctx,
                      *, scale):
    h = pl.program_id(2)     # head index    (reduction for the output tile)
    ki = pl.program_id(3)    # kv-tile index (reduction for the context)
    nh = pl.num_programs(2)
    nk = pl.num_programs(3)

    @pl.when((h == 0) & (ki == 0))
    def _init_out():
        acc_out[...] = jnp.zeros_like(acc_out)

    @pl.when(ki == 0)
    def _init_head():
        m_sc[...] = jnp.full(m_sc.shape, -jnp.inf, dtype=m_sc.dtype)
        l_sc[...] = jnp.zeros_like(l_sc)
        acc_ctx[...] = jnp.zeros_like(acc_ctx)

    q = q_ref[0, 0]                       # (tq, hd)  -- input dtype
    k = k_ref[0, 0]                       # (tk, hd)
    v = v_ref[0, 0]                       # (tk, hd)

    # Scores: contract head_dim directly (no explicit transpose of K).
    s = lax.dot_general(q, k, (((1,), (1,)), ((), ())),
                        preferred_element_type=jnp.float32) * scale   # (tq, tk)

    # Online softmax over kv tiles (f32 stats, f32 accumulators).
    m_prev = m_sc[...]
    m_new = jnp.maximum(m_prev, jnp.max(s, axis=-1, keepdims=True))
    alpha = jnp.exp(m_prev - m_new)
    p = jnp.exp(s - m_new)
    l_sc[...] = alpha * l_sc[...] + jnp.sum(p, axis=-1, keepdims=True)
    acc_ctx[...] = alpha * acc_ctx[...] + jnp.dot(
        p.astype(v.dtype), v, preferred_element_type=jnp.float32)
    m_sc[...] = m_new

    @pl.when(ki == nk - 1)
    def _finalize_head():
        # Normalize this head's context, then fold in its slice of the output
        # projection: (tq, hd) @ (hd, E) accumulated into the (tq, E) output.
        # wo_ref holds ALL heads (VMEM-resident); slice the current head.
        ctx = acc_ctx[...] * pl.reciprocal(l_sc[...], approx=True)
        acc_out[...] += jnp.dot(ctx.astype(wo_ref.dtype), wo_ref[h],
                                preferred_element_type=jnp.float32)

    @pl.when((h == nh - 1) & (ki == nk - 1))
    def _write_out():
        out_ref[0] = (acc_out[...] + bo_ref[...]).astype(out_ref.dtype)


def _pick_tile(S):
    # 256 matches the v6e/v7x 2x256x256 MXU pass; 128 suits v5e.  512 is
    # intentionally dropped (1 MiB live f32 score/prob temporaries -> spill).
    for t in (256, 128):
        if S % t == 0:
            return t
    return S


def _vmem_limit_bytes():
    # Generation-aware scoped-VMEM budget (v7x has 64 MiB/TC vs 128 MiB on
    # v5e/v6e); leave headroom for Mosaic's own scratch.
    try:
        cap = int(pltpu.get_tpu_info().vmem_capacity_bytes)
    except Exception:
        cap = 64 * 1024 * 1024
    return min(cap // 2, 64 * 1024 * 1024)


def multi_head_attention(hidden_states, w_qkv, b_qkv, w_out, b_out, num_heads):
    """hidden_states: [B, S, E]; w_qkv: [E, 3E] ([in, out]); b_qkv: [3E];
       w_out: [E, E] ([in, out]); b_out: [E]."""
    B, S, E = hidden_states.shape
    H = num_heads
    hd = E // H
    scale = 1.0 / math.sqrt(hd)
    in_dt = hidden_states.dtype

    # --- QKV projection once, at full MXU width, in plain XLA ------------
    qkv = (hidden_states @ w_qkv + b_qkv).astype(in_dt)      # (B, S, 3E)
    qkv = qkv.reshape(B, S, 3, H, hd)
    qkv = jnp.transpose(qkv, (2, 0, 3, 1, 4))                # (3, B, H, S, hd)
    q, k, v = qkv[0], qkv[1], qkv[2]                         # (B, H, S, hd)

    # Head-major output-projection weight; single VMEM-resident block.
    wo = w_out.reshape(H, hd, E)                             # (H, hd, E)
    bo = b_out.reshape(1, E)

    tq = _pick_tile(S)
    tk = tq
    nq = S // tq
    nk = S // tk

    kernel = functools.partial(_mha_flash_kernel, scale=scale)

    return pl.pallas_call(
        kernel,
        out_shape=jax.ShapeDtypeStruct((B, S, E), in_dt),
        grid_spec=pltpu.PrefetchScalarGridSpec(
            num_scalar_prefetch=0,
            grid=(B, nq, H, nk),
            in_specs=[
                pl.BlockSpec((1, 1, tq, hd), lambda b, qi, h, ki: (b, h, qi, 0)),  # q
                pl.BlockSpec((1, 1, tk, hd), lambda b, qi, h, ki: (b, h, ki, 0)),  # k
                pl.BlockSpec((1, 1, tk, hd), lambda b, qi, h, ki: (b, h, ki, 0)),  # v
                pl.BlockSpec((H, hd, E),     lambda b, qi, h, ki: (0, 0, 0)),      # wo (resident)
                pl.BlockSpec((1, E),         lambda b, qi, h, ki: (0, 0)),         # bo (resident)
            ],
            out_specs=pl.BlockSpec((1, tq, E), lambda b, qi, h, ki: (b, qi, 0)),
            scratch_shapes=[
                pltpu.VMEM((tq, E), jnp.float32),    # output accumulator
                pltpu.VMEM((tq, 1), jnp.float32),    # running max
                pltpu.VMEM((tq, 1), jnp.float32),    # running denominator
                pltpu.VMEM((tq, hd), jnp.float32),   # per-head ctx accumulator
            ],
        ),
        compiler_params=pltpu.CompilerParams(
            dimension_semantics=("parallel", "parallel", "arbitrary", "arbitrary"),
            vmem_limit_bytes=_vmem_limit_bytes(),
        ),
    )(q, k, v, wo, bo)


def _reference(hidden_states, w_qkv, b_qkv, w_out, b_out, num_heads):
    """Pure-JAX mirror of the PyTorch forward (attention_mask=None)."""
    B, S, E = hidden_states.shape
    hd = E // num_heads
    qkv = hidden_states @ w_qkv + b_qkv                     # (B, S, 3E)
    qkv = qkv.reshape(B, S, 3, num_heads, hd)
    qkv = jnp.transpose(qkv, (2, 0, 3, 1, 4))               # (3, B, H, S, hd)
    q, k, v = qkv[0], qkv[1], qkv[2]
    scores = jnp.einsum("bhqd,bhkd->bhqk", q, k) / math.sqrt(hd)
    probs = jax.nn.softmax(scores, axis=-1)
    ctx = jnp.einsum("bhqk,bhkd->bhqd", probs, v)           # (B, H, S, hd)
    ctx = jnp.transpose(ctx, (0, 2, 1, 3)).reshape(B, S, E)
    return ctx @ w_out + b_out


if __name__ == "__main__":
    B, S, E, H = 2, 8, 32, 4

    key = jax.random.PRNGKey(0)
    kx, kw1, kb1, kw2, kb2 = jax.random.split(key, 5)

    bound1 = 1.0 / math.sqrt(E)
    x = jax.random.normal(kx, (B, S, E), dtype=jnp.float32)
    w_qkv = jax.random.uniform(kw1, (E, 3 * E), minval=-bound1, maxval=bound1,
                               dtype=jnp.float32)
    b_qkv = jax.random.uniform(kb1, (3 * E,), minval=-bound1, maxval=bound1,
                               dtype=jnp.float32)
    w_out = jax.random.uniform(kw2, (E, E), minval=-bound1, maxval=bound1,
                               dtype=jnp.float32)
    b_out = jax.random.uniform(kb2, (E,), minval=-bound1, maxval=bound1,
                               dtype=jnp.float32)

    out = multi_head_attention(x, w_qkv, b_qkv, w_out, b_out, num_heads=H)
    out = jax.block_until_ready(out)

    ref = _reference(x, w_qkv, b_qkv, w_out, b_out, num_heads=H)
    assert out.shape == (B, S, E)
    # approx reciprocal (EUP vrcp) + online-softmax reordering -> loosen a bit
    assert jnp.allclose(out, ref, atol=2e-3, rtol=2e-3), "mismatch vs reference"

    print("KERNEL_OK")
</pallas_src>

<mosaic_0001>
module attributes {stable_mosaic.version = 11 : i64} {
  func.func @_mha_flash_kernel(%arg0: i32, %arg1: i32, %arg2: i32, %arg3: i32, %arg4: memref<1x1x8x8xf32, #tpu.memory_space<vmem>>, %arg5: memref<1x1x8x8xf32, #tpu.memory_space<vmem>>, %arg6: memref<1x1x8x8xf32, #tpu.memory_space<vmem>>, %arg7: memref<4x8x32xf32, #tpu.memory_space<vmem>>, %arg8: memref<1x32xf32, #tpu.memory_space<vmem>>, %arg9: memref<1x8x32xf32, #tpu.memory_space<vmem>>, %arg10: memref<8x32xf32, #tpu.memory_space<vmem>>, %arg11: memref<8x1xf32, #tpu.memory_space<vmem>>, %arg12: memref<8x1xf32, #tpu.memory_space<vmem>>, %arg13: memref<8x8xf32, #tpu.memory_space<vmem>>) attributes {dimension_semantics = [#tpu.dimension_semantics<parallel>, #tpu.dimension_semantics<parallel>, #tpu.dimension_semantics<arbitrary>, #tpu.dimension_semantics<arbitrary>], iteration_bounds = array<i64: 2, 1, 4, 1>, scalar_prefetch = 0 : i64, scratch_operands = 4 : i64, tpu.core_type = #tpu.core_type<tc>, window_params = [{transform_indices = @transform_0, window_bounds = array<i64: 1, 1, 8, 8>}, {transform_indices = @transform_1, window_bounds = array<i64: 1, 1, 8, 8>}, {transform_indices = @transform_2, window_bounds = array<i64: 1, 1, 8, 8>}, {pipeline_mode = #tpu.pipeline_mode<synchronous>, transform_indices = @transform_3, window_bounds = array<i64: 4, 8, 32>}, {pipeline_mode = #tpu.pipeline_mode<synchronous>, transform_indices = @transform_4, window_bounds = array<i64: 1, 32>}, {transform_indices = @transform_5, window_bounds = array<i64: 1, 8, 32>}]} {
    %c0_i32 = arith.constant 0 : i32
    %0 = arith.cmpi eq, %arg2, %c0_i32 : i32
    %c0_i32_0 = arith.constant 0 : i32
    %1 = arith.cmpi eq, %arg3, %c0_i32_0 : i32
    %2 = arith.andi %0, %1 : i1
    %3 = arith.extui %2 : i1 to i32
    %c0_i32_1 = arith.constant 0 : i32
    %4 = arith.cmpi ne, %3, %c0_i32_1 : i32
    scf.if %4 {
      %cst_35 = arith.constant 0.000000e+00 : f32
      %47 = vector.broadcast %cst_35 : f32 to vector<8x32xf32>
      %c0_36 = arith.constant 0 : index
      %c0_37 = arith.constant 0 : index
      %48 = vector.load %arg10[%c0_36, %c0_37] : memref<8x32xf32, #tpu.memory_space<vmem>>, vector<8x32xf32>
      tpu.vector_store %arg10[%c0_36, %c0_37], %47 {strides = array<i32>} : memref<8x32xf32, #tpu.memory_space<vmem>>, vector<8x32xf32>,
    } else {
    }
    %c0_i32_2 = arith.constant 0 : i32
    %5 = arith.cmpi eq, %arg3, %c0_i32_2 : i32
    %6 = arith.extui %5 : i1 to i32
    %c0_i32_3 = arith.constant 0 : i32
    %7 = arith.cmpi ne, %6, %c0_i32_3 : i32
    scf.if %7 {
      %cst_35 = arith.constant 0xFF800000 : f32
      %47 = vector.broadcast %cst_35 : f32 to vector<8x1xf32>
      %c0_36 = arith.constant 0 : index
      %c0_37 = arith.constant 0 : index
      %48 = vector.load %arg11[%c0_36, %c0_37] : memref<8x1xf32, #tpu.memory_space<vmem>>, vector<8x1xf32>
      tpu.vector_store %arg11[%c0_36, %c0_37], %47 {strides = array<i32>} : memref<8x1xf32, #tpu.memory_space<vmem>>, vector<8x1xf32>,
      %cst_38 = arith.constant 0.000000e+00 : f32
      %49 = vector.broadcast %cst_38 : f32 to vector<8x1xf32>
      %c0_39 = arith.constant 0 : index
      %c0_40 = arith.constant 0 : index
      %50 = vector.load %arg12[%c0_39, %c0_40] : memref<8x1xf32, #tpu.memory_space<vmem>>, vector<8x1xf32>
      tpu.vector_store %arg12[%c0_39, %c0_40], %49 {strides = array<i32>} : memref<8x1xf32, #tpu.memory_space<vmem>>, vector<8x1xf32>,
      %cst_41 = arith.constant 0.000000e+00 : f32
      %51 = vector.broadcast %cst_41 : f32 to vector<8x8xf32>
      %c0_42 = arith.constant 0 : index
      %c0_43 = arith.constant 0 : index
      %52 = vector.load %arg13[%c0_42, %c0_43] : memref<8x8xf32, #tpu.memory_space<vmem>>, vector<8x8xf32>
      tpu.vector_store %arg13[%c0_42, %c0_43], %51 {strides = array<i32>} : memref<8x8xf32, #tpu.memory_space<vmem>>, vector<8x8xf32>,
    } else {
    }
    %c0 = arith.constant 0 : index
    %c0_4 = arith.constant 0 : index
    %c0_5 = arith.constant 0 : index
    %c0_6 = arith.constant 0 : index
    %8 = vector.load %arg4[%c0, %c0_4, %c0_5, %c0_6] : memref<1x1x8x8xf32, #tpu.memory_space<vmem>>, vector<1x1x8x8xf32>
    %9 = vector.shape_cast %8 : vector<1x1x8x8xf32> to vector<8x8xf32>
    %c0_7 = arith.constant 0 : index
    %c0_8 = arith.constant 0 : index
    %c0_9 = arith.constant 0 : index
    %c0_10 = arith.constant 0 : index
    %10 = vector.load %arg5[%c0_7, %c0_8, %c0_9, %c0_10] : memref<1x1x8x8xf32, #tpu.memory_space<vmem>>, vector<1x1x8x8xf32>
    %11 = vector.shape_cast %10 : vector<1x1x8x8xf32> to vector<8x8xf32>
    %c0_11 = arith.constant 0 : index
    %c0_12 = arith.constant 0 : index
    %c0_13 = arith.constant 0 : index
    %c0_14 = arith.constant 0 : index
    %12 = vector.load %arg6[%c0_11, %c0_12, %c0_13, %c0_14] : memref<1x1x8x8xf32, #tpu.memory_space<vmem>>, vector<1x1x8x8xf32>
    %13 = vector.shape_cast %12 : vector<1x1x8x8xf32> to vector<8x8xf32>
    %cst = arith.constant dense<0.000000e+00> : vector<8x8xf32>
    %14 = tpu.matmul %9, %11, %cst {dimension_numbers = #tpu.dot_dimension_numbers<[1], [1], [0], [0], [0, 0, 1, 0], [], []>} : vector<8x8xf32>, vector<8x8xf32>, vector<8x8xf32> -> vector<8x8xf32>
    %cst_15 = arith.constant 0.353553385 : f32
    %15 = vector.broadcast %cst_15 : f32 to vector<8x8xf32>
    %16 = arith.mulf %14, %15 : vector<8x8xf32>
    %c0_16 = arith.constant 0 : index
    %c0_17 = arith.constant 0 : index
    %17 = vector.load %arg11[%c0_16, %c0_17] : memref<8x1xf32, #tpu.memory_space<vmem>>, vector<8x1xf32>
    %cst_18 = arith.constant dense<0xFF800000> : vector<8xf32>
    %18 = vector.multi_reduction <maximumf>, %16, %cst_18 [1] : vector<8x8xf32> to vector<8xf32>
    %19 = vector.shape_cast %18 : vector<8xf32> to vector<8x1xf32>
    %20 = arith.maximumf %17, %19 : vector<8x1xf32>
    %21 = arith.subf %17, %20 : vector<8x1xf32>
    %22 = math.exp %21 : vector<8x1xf32>
    %23 = vector.broadcast %20 : vector<8x1xf32> to vector<8x8xf32>
    %24 = arith.subf %16, %23 : vector<8x8xf32>
    %25 = math.exp %24 : vector<8x8xf32>
    %c0_19 = arith.constant 0 : index
    %c0_20 = arith.constant 0 : index
    %26 = vector.load %arg12[%c0_19, %c0_20] : memref<8x1xf32, #tpu.memory_space<vmem>>, vector<8x1xf32>
    %27 = arith.mulf %22, %26 : vector<8x1xf32>
    %cst_21 = arith.constant dense<0.000000e+00> : vector<8xf32>
    %28 = vector.multi_reduction <add>, %25, %cst_21 [1] : vector<8x8xf32> to vector<8xf32>
    %29 = vector.shape_cast %28 : vector<8xf32> to vector<8x1xf32>
    %30 = arith.addf %27, %29 : vector<8x1xf32>
    %c0_22 = arith.constant 0 : index
    %c0_23 = arith.constant 0 : index
    %31 = vector.load %arg12[%c0_22, %c0_23] : memref<8x1xf32, #tpu.memory_space<vmem>>, vector<8x1xf32>
    tpu.vector_store %arg12[%c0_22, %c0_23], %30 {strides = array<i32>} : memref<8x1xf32, #tpu.memory_space<vmem>>, vector<8x1xf32>,
    %c0_24 = arith.constant 0 : index
    %c0_25 = arith.constant 0 : index
    %32 = vector.load %arg13[%c0_24, %c0_25] : memref<8x8xf32, #tpu.memory_space<vmem>>, vector<8x8xf32>
    %33 = vector.broadcast %22 : vector<8x1xf32> to vector<8x8xf32>
    %34 = arith.mulf %33, %32 : vector<8x8xf32>
    %cst_26 = arith.constant dense<0.000000e+00> : vector<8x8xf32>
    %35 = tpu.matmul %25, %13, %cst_26 {dimension_numbers = #tpu.dot_dimension_numbers<[1], [0], [0], [1], [0, 0, 1, 1], [], []>} : vector<8x8xf32>, vector<8x8xf32>, vector<8x8xf32> -> vector<8x8xf32>
    %36 = arith.addf %34, %35 : vector<8x8xf32>
    %c0_27 = arith.constant 0 : index
    %c0_28 = arith.constant 0 : index
    %37 = vector.load %arg13[%c0_27, %c0_28] : memref<8x8xf32, #tpu.memory_space<vmem>>, vector<8x8xf32>
    tpu.vector_store %arg13[%c0_27, %c0_28], %36 {strides = array<i32>} : memref<8x8xf32, #tpu.memory_space<vmem>>, vector<8x8xf32>,
    %c0_29 = arith.constant 0 : index
    %c0_30 = arith.constant 0 : index
    %38 = vector.load %arg11[%c0_29, %c0_30] : memref<8x1xf32, #tpu.memory_space<vmem>>, vector<8x1xf32>
    tpu.vector_store %arg11[%c0_29, %c0_30], %20 {strides = array<i32>} : memref<8x1xf32, #tpu.memory_space<vmem>>, vector<8x1xf32>,
    %c0_i32_31 = arith.constant 0 : i32
    %39 = arith.cmpi eq, %arg3, %c0_i32_31 : i32
    %40 = arith.extui %39 : i1 to i32
    %c0_i32_32 = arith.constant 0 : i32
    %41 = arith.cmpi ne, %40, %c0_i32_32 : i32
    scf.if %41 {
      %c0_35 = arith.constant 0 : index
      %c0_36 = arith.constant 0 : index
      %47 = vector.load %arg13[%c0_35, %c0_36] : memref<8x8xf32, #tpu.memory_space<vmem>>, vector<8x8xf32>
      %c0_37 = arith.constant 0 : index
      %c0_38 = arith.constant 0 : index
      %48 = vector.load %arg12[%c0_37, %c0_38] : memref<8x1xf32, #tpu.memory_space<vmem>>, vector<8x1xf32>
      %49 = tpu.reciprocal %48 {approx = true} : vector<8x1xf32> -> vector<8x1xf32>
      %50 = vector.broadcast %49 : vector<8x1xf32> to vector<8x8xf32>
      %51 = arith.mulf %47, %50 : vector<8x8xf32>
      %c0_39 = arith.constant 0 : index
      %c0_40 = arith.constant 0 : index
      %52 = vector.load %arg10[%c0_39, %c0_40] : memref<8x32xf32, #tpu.memory_space<vmem>>, vector<8x32xf32>
      %53 = arith.index_cast %arg2 : i32 to index
      %c0_41 = arith.constant 0 : index
      %c0_42 = arith.constant 0 : index
      %54 = vector.load %arg7[%53, %c0_41, %c0_42] : memref<4x8x32xf32, #tpu.memory_space<vmem>>, vector<1x8x32xf32>
      %55 = vector.shape_cast %54 : vector<1x8x32xf32> to vector<8x32xf32>
      %cst_43 = arith.constant dense<0.000000e+00> : vector<8x32xf32>
      %56 = tpu.matmul %51, %55, %cst_43 {dimension_numbers = #tpu.dot_dimension_numbers<[1], [0], [0], [1], [0, 0, 1, 1], [], []>} : vector<8x8xf32>, vector<8x32xf32>, vector<8x32xf32> -> vector<8x32xf32>
      %57 = arith.addf %52, %56 : vector<8x32xf32>
      %c0_44 = arith.constant 0 : index
      %c0_45 = arith.constant 0 : index
      %58 = vector.load %arg10[%c0_44, %c0_45] : memref<8x32xf32, #tpu.memory_space<vmem>>, vector<8x32xf32>
      tpu.vector_store %arg10[%c0_44, %c0_45], %57 {strides = array<i32>} : memref<8x32xf32, #tpu.memory_space<vmem>>, vector<8x32xf32>,
    } else {
    }
    %c3_i32 = arith.constant 3 : i32
    %42 = arith.cmpi eq, %arg2, %c3_i32 : i32
    %c0_i32_33 = arith.constant 0 : i32
    %43 = arith.cmpi eq, %arg3, %c0_i32_33 : i32
    %44 = arith.andi %42, %43 : i1
    %45 = arith.extui %44 : i1 to i32
    %c0_i32_34 = arith.constant 0 : i32
    %46 = arith.cmpi ne, %45, %c0_i32_34 : i32
    scf.if %46 {
      %c0_35 = arith.constant 0 : index
      %c0_36 = arith.constant 0 : index
      %47 = vector.load %arg10[%c0_35, %c0_36] : memref<8x32xf32, #tpu.memory_space<vmem>>, vector<8x32xf32>
      %c0_37 = arith.constant 0 : index
      %c0_38 = arith.constant 0 : index
      %48 = vector.load %arg8[%c0_37, %c0_38] : memref<1x32xf32, #tpu.memory_space<vmem>>, vector<1x32xf32>
      %49 = vector.broadcast %48 : vector<1x32xf32> to vector<8x32xf32>
      %50 = arith.addf %47, %49 : vector<8x32xf32>
      %c0_39 = arith.constant 0 : index
      %c0_40 = arith.constant 0 : index
      %c0_41 = arith.constant 0 : index
      %51 = vector.load %arg9[%c0_39, %c0_40, %c0_41] : memref<1x8x32xf32, #tpu.memory_space<vmem>>, vector<1x8x32xf32>
      %52 = vector.shape_cast %51 : vector<1x8x32xf32> to vector<8x32xf32>
      %53 = vector.shape_cast %50 : vector<8x32xf32> to vector<1x8x32xf32>
      tpu.vector_store %arg9[%c0_39, %c0_40, %c0_41], %53 {strides = array<i32>} : memref<1x8x32xf32, #tpu.memory_space<vmem>>, vector<1x8x32xf32>,
    } else {
    }
    return
  }
  func.func @transform_0(%arg0: i32, %arg1: i32, %arg2: i32, %arg3: i32) -> (i32, i32, i32, i32) {
    %c0_i32 = arith.constant 0 : i32
    %c0_i32_0 = arith.constant 0 : i32
    return %arg0, %arg2, %arg1, %c0_i32 : i32, i32, i32, i32
  }
  func.func @transform_1(%arg0: i32, %arg1: i32, %arg2: i32, %arg3: i32) -> (i32, i32, i32, i32) {
    %c0_i32 = arith.constant 0 : i32
    %c0_i32_0 = arith.constant 0 : i32
    return %arg0, %arg2, %arg3, %c0_i32 : i32, i32, i32, i32
  }
  func.func @transform_2(%arg0: i32, %arg1: i32, %arg2: i32, %arg3: i32) -> (i32, i32, i32, i32) {
    %c0_i32 = arith.constant 0 : i32
    %c0_i32_0 = arith.constant 0 : i32
    return %arg0, %arg2, %arg3, %c0_i32 : i32, i32, i32, i32
  }
  func.func @transform_3(%arg0: i32, %arg1: i32, %arg2: i32, %arg3: i32) -> (i32, i32, i32) {
    %c0_i32 = arith.constant 0 : i32
    %c0_i32_0 = arith.constant 0 : i32
    %c0_i32_1 = arith.constant 0 : i32
    %c0_i32_2 = arith.constant 0 : i32
    return %c0_i32, %c0_i32_0, %c0_i32_1 : i32, i32, i32
  }
  func.func @transform_4(%arg0: i32, %arg1: i32, %arg2: i32, %arg3: i32) -> (i32, i32) {
    %c0_i32 = arith.constant 0 : i32
    %c0_i32_0 = arith.constant 0 : i32
    %c0_i32_1 = arith.constant 0 : i32
    return %c0_i32, %c0_i32_0 : i32, i32
  }
  func.func @transform_5(%arg0: i32, %arg1: i32, %arg2: i32, %arg3: i32) -> (i32, i32, i32) {
    %c0_i32 = arith.constant 0 : i32
    %c0_i32_0 = arith.constant 0 : i32
    return %arg0, %arg1, %c0_i32 : i32, i32, i32
  }
}

</mosaic_0001>

<bundles_post_ra>
// kernel: tpu_custom_call.1
= control target key start
LH: loop header
LB: loop body
LE: loop exit
PB: predicated region body
PF: predicated region fallthrough
CT: control target
= control target key end

     0   :  { %s1714_s0 = inlined_call_operand.hbm [shape: f32[2,4,8,8], index: 0, kind: input, shape index: {}]   ;;  %s1715_s1 = inlined_call_operand.hbm [shape: f32[2,4,8,8], index: 1, kind: input, shape index: {}]   ;;  %s1716_s2 = inlined_call_operand.hbm [shape: f32[2,4,8,8], index: 2, kind: input, shape index: {}]   ;;  %s1717_s3 = inlined_call_operand.hbm [shape: f32[4,8,32], index: 3, kind: input, shape index: {}]   ;;  %s1718_s4 = inlined_call_operand.vmem [shape: f32[1,32], index: 4, kind: input, shape index: {}]   ;;  %s1719_s5 = inlined_call_operand.hbm [shape: f32[2,8,32], index: 5, kind: output, shape index: {}]  }
   0x1   :  { %1741 = sst [smem:[#allocation31_spill]] %s1715_s1 }
   0x2   :  { %1742 = sst [smem:[#allocation32_spill]] %s1718_s4 }
   0x3   :  { %1743 = sst [smem:[#allocation33_spill]] %s1719_s5 }
   0x4   :  { %10 = vsyncpa [#allocation7], 0 }
   0x5   :  { %12 = vsyncpa [#allocation7 + $0x1], 0 }
   0x6   :  { %13 = vsyncpa [#allocation10], 0 }
   0x7   :  { %15 = vsyncpa [#allocation10 + $0x1], 0 }
   0x8   :  { %16 = vsyncpa [#allocation13], 0 }
   0x9   :  { %17 = vsyncpa [#allocation8], 0 }
   0xa   :  { %19 = vsyncpa [#allocation8 + $0x1], 0  ;;  %s1339_s18 = smov 0   ;;  %s1341_s19 = smov 0  }
   0xb   :  { %s1343_s20 = smov 0   ;;  %s1345_s21 = smov 0  }
   0xc   :  { %s1347_s22 = smov 0   ;;  %s1349_s23 = smov 0  }
   0xd   :  { %s1351_s24 = smov 0   ;;  %s1353_s25 = smov 0  }
   0xe   :  { %s1355_s26 = smov 0   ;;  %s1357_s27 = smov 0  }
   0xf   :  { %s1359_s28 = smov 0  }
  0x10 LB: > { %1744 = sst [smem:[#allocation19_spill]] %s1255_s18  ;;  %s43_s29 = sadd.s32 1, %s1287_s26  ;;  %s1295_s28 = sphi %s1359_s28, %s25_s28   ;;  %s1291_s27 = sphi %s1357_s27, %s1788_s27   ;;  %s1287_s26 = sphi %s1355_s26, %s1787_s26   ;;  %s1283_s25 = sphi %s1353_s25, %s1786_s25   ;;  %s1279_s24 = sphi %s1351_s24, %s1785_s24   ;;  %s1275_s23 = sphi %s1349_s23, %s1793_s23   ;;  %s1271_s22 = sphi %s1347_s22, %s1792_s22   ;;  %s1267_s21 = sphi %s1345_s21, %s1791_s21   ;;  %s1263_s20 = sphi %s1343_s20, %s1783_s20   ;;  %s1259_s19 = sphi %s1341_s19, %s1790_s19   ;;  %s1255_s18 = sphi %s1339_s18, %s1789_s18  }
  0x11   : > { %1745 = sst [smem:[#allocation20_spill]] %s1263_s20  ;;  %s51_s30 = sadd.s32 1, %s1291_s27 }
  0x12   : > { %1746 = sst [smem:[#allocation21_spill]] %s1283_s25  ;;  %p45_p0 = scmp.ge.s32.totalorder %s43_s29, 4 }
  0x13   : > { %1747 = sst [smem:[#allocation22_spill]] %s1287_s26  ;;  %s62_s6 = sadd.s32 1, %s1275_s23 }
  0x14   : > { %1748 = sst [smem:[#allocation23_spill]] %s1291_s27  ;;  %p69_p1 = scmp.ne.s32.totalorder %s1275_s23, %s1271_s22 }
  0x15   : > { %1749 = sst [smem:[#allocation24_spill]] %s1295_s28  ;;  %p70_p2 = scmp.eq.s32.totalorder %s1295_s28, 0 }
  0x16   : > { %s1795_s29 = smov (%p45_p0, %s43_s29), 0  ;;  %s1797_s30 = smov (!%p45_p0, %s51_s30), %s1291_s27 }
  0x17   : > { %1750 = sst [smem:[#allocation25_spill]] %s1795_s29  ;;  %s56_s7 = ssub.s32 %s1287_s26, %s1795_s29 }
  0x18   : > { %p1405_p3 = por %p70_p2, %p69_p1  ;;  %p53_p4 = scmp.ge.s32.totalorder %s1797_s30, 2 }
  0x19   : > { %s192_s9 = sadd.s32 1, %s1263_s20  ;;  %p940_p5 = scmp.lt.s32.totalorder %s1295_s28, 8 }
  0x1a   : > { %s1799_s30 = smov (%p53_p4, %s1797_s30), 0  ;;  %s1722_s10 = sand.u32 1, %s1275_s23  }
  0x1b   : > { %1752 = sst [smem:[#allocation26_spill]] %s1799_s30  ;;  %s860_s11 = sshll.u32 %s1291_s27, 2 }
  0x1c   : > { %s55_s12 = ssub.s32 %s1291_s27, %s1799_s30  ;;  %s1419_s13 = sshll.u32 %s1722_s10, 3 }
  0x1d   : > { %s57_s14 = sor.u32 %s56_s7, %s55_s12  ;;  %p190_p6 = scmp.eq.s32.totalorder %s55_s12, 0 }
  0x1e   : > { %p60_p7 = scmp.eq.s32.totalorder %s57_s14, 0  ;;  %s255_s15 = sadd.s32 %s1287_s26, %s860_s11 }
  0x1f   : > { %s1423_s16 = scalar_select %p190_p6, %s1263_s20, %s192_s9  }
  0x20   : > { %s1426_s17 = scalar_select %p60_p7, %s1275_s23, %s62_s6  }
  0x21   : > { %1753 = sst [smem:[#allocation27_spill]] %s1423_s16  ;;  %s1428_s29 = sshll.u32 %s255_s15, 7 }
  0x22   : > { %1754 = sst [smem:[#allocation28_spill]] %s1426_s17  ;;  %p1434_p8 = pnand %p940_p5, %p1405_p3 }
  0x23   : > { %s266_s10 = sand.u32 1, %s1295_s28   ;;  %s1756_s1 = sld [smem:[#allocation31_spill]] }
  0x24   : > { %s1755_s5 = scalar_select %p1434_p8, 1, 0 }
  0x25   : > { %s270_s6 = scalar_lea.vmem [#allocation9], %s1419_s13  ;;  %s1448_s8 = scalar_lea.sflag [#allocation10], %s266_s10 }
  0x26   : > { %s280_s9 = sshll.u32 %s270_s6, 4  ;;  %p1454_p10 = pneg %p1434_p8  ;;  %s1446_s9 = int_to_ptr.vmem [resolvable:$true] %s280_s9 }
  0x28   : > { %s1757_s14 = scalar_select %p1454_p10, 1, 0 }
  0x29   : > { %s1443_s12 = scalar_lea.hbm %s1756_s1, %s1428_s29  ;;  %s1052_s7 = scalar_lea.hbm %s1756_s1, 1024 }
  0x2a   : > { %s1047_s11 = scalar_lea.hbm %s1443_s12, 128  ;;  %p1053_p13 = scmp.lt.u32.totalorder %s1443_s12, %s1756_s1 }
  0x2b   : > { %p1048_p9 = scmp.ne.s32.totalorder %s1443_s12, %s1047_s11  ;;  %p1054_p0 = scmp.lt.u32.totalorder %s1052_s7, %s1047_s11 }
  0x2c   : > { %p1056_p2 = scmp.lt.u32.totalorder %s1047_s11, %s1443_s12 }
  0x2d   : > { %p1050_p11 = pnand %p1454_p10, %p1048_p9  ;;  %p1055_p1 = por %p1054_p0, %p1053_p13 }
  0x2f   : > { %p1051_p12 = pneg %p1050_p11  ;;  %p1057_p3 = por %p1056_p2, %p1055_p1 }
  0x31   : > { %p1058_p4 = pnand %p1057_p3, %p1051_p12 }
  0x33   : > { %1061 = shalt.err (!%p1058_p4)
}
  0x34   : > { %s1062_s10 = scalar_lea.vmem %s1446_s9, 128  ;;  %s1297_s30 = smov [#allocation9]  }
  0x35   : > { %p1063_p5 = scmp.ne.s32.totalorder %s1446_s9, %s1062_s10  ;;  %s1067_s15 = sshll.u32 %s1297_s30, 4  ;;  %s1068_s15 = int_to_ptr.vmem [resolvable:$false] %s1067_s15 }
  0x36   : > { %s1069_s27 = scalar_lea.vmem %s1068_s15, 256  ;;  %p1070_p9 = scmp.lt.s32.totalorder %s1446_s9, %s1068_s15 }
  0x37   : > { %p1065_p6 = pnand %p1063_p5, %p1454_p10  ;;  %p1071_p11 = scmp.lt.s32.totalorder %s1069_s27, %s1062_s10 }
  0x39   : > { %p1066_p7 = pneg %p1065_p6  ;;  %p1072_p13 = por %p1071_p11, %p1070_p9 }
  0x3b   : > { %p1073_p0 = pnand %p1072_p13, %p1066_p7 }
  0x3d   : > { %1076 = shalt.err (!%p1073_p0)
}
  0x3e   : > { %931 = dma.hbm_to_vmem [thread:$0]  (!%p1434_p8), %s1443_s12, 128, %s1446_s9, %s1448_s8  }
  0x3f   : > { %s1479_s11 = sadd.s32 4294967295, %s1295_s28   ;;  %s855_s7 = sadd.s32 4294967294, %s1295_s28  }
  0x40   : > { %p75_p12 = scmp.ne.s32.totalorder %s1271_s22, %s1267_s21  ;;  %p1729_p1 = scmp.eq.s32.totalorder %s1479_s11, 0 }
  0x41   : > { %p202_p2 = scmp.ne.s32.totalorder %s1263_s20, %s1259_s19  ;;  %p203_p3 = scmp.eq.s32.totalorder %s1479_s11, 7 }
  0x42   : > { %p208_p4 = scmp.ne.s32.totalorder %s1259_s19, %s1255_s18  ;;  %p1492_p5 = por %p1729_p1, %p75_p12 }
  0x43   : > { %p209_p6 = scmp.eq.s32.totalorder %s855_s7, 7  ;;  %p1496_p7 = por %p203_p3, %p202_p2 }
  0x44   : > { %s1758_s6 = scalar_select %p1492_p5, 1, 0 }
  0x45   : > { %s1759_s12 = scalar_select %p1496_p7, 1, 0 }
  0x46   : > { %p856_p9 = scmp.ge.s32.totalorder %s1295_s28, 1  ;;  %p1501_p11 = por %p209_p6, %p208_p4 }
  0x47   : > { %1760 = sst [smem:[#allocation29_spill]] %s1759_s12  ;;  %p216_p13 = scmp.lt.s32.totalorder %s1295_s28, 9 }
  0x48   : > { %s1761_s21 = scalar_select %p1501_p11, 1, 0 }
  0x49   : > { %p1506_p0 = pnand %p856_p9, %p216_p13  ;;  %s1298_s10 = smov [#allocation12]  }
  0x4a   : > { %1762 = sst [smem:[#allocation30_spill]] %s1761_s21  ;;  %s228_s30 = sshll.u32 %s1298_s10, 4  ;;  %s1510_s30 = int_to_ptr.vmem [resolvable:$true] %s228_s30 }
  0x4b   : > { %s1763_s9 = scalar_select %p1506_p0, 1, 0 }
  0x4c   : > { %p921_p12 = pneg %p1506_p0  ;;  %s1524_s1 = scalar_lea.hbm %s1714_s0, %s1428_s29 }
  0x4d   : > { %s249_s26 = scalar_lea.vmem [#allocation6], %s1419_s13  ;;  %s1077_s20 = scalar_lea.hbm %s1717_s3, 512 }
  0x4e   : > { %p1516_p2 = pnand %p921_p12, %p1729_p1  ;;  %s259_s17 = sshll.u32 %s249_s26, 4  ;;  %s1527_s17 = int_to_ptr.vmem [resolvable:$true] %s259_s17 }
  0x4f   : > { %p1078_p3 = scmp.ne.s32.totalorder %s1717_s3, %s1077_s20  ;;  %p1084_p13 = scmp.lt.u32.totalorder %s1077_s20, %s1717_s3 }
  0x50   : > { %p1079_p4 = pneg %p1516_p2 }
  0x52   : > { %p1080_p6 = pnand %p1079_p4, %p1078_p3 }
  0x54   : > { %p1081_p9 = pneg %p1080_p6 }
  0x56   : > { %p1086_p12 = pnand %p1084_p13, %p1081_p9 }
  0x58   : > { %1089 = shalt.err (!%p1086_p12)
}
  0x59   : > { %s1090_s26 = scalar_lea.vmem %s1510_s30, 512  ;;  %p1098_p5 = scmp.lt.s32.totalorder %s1510_s30, %s1510_s30 }
  0x5a   : > { %p1091_p1 = scmp.ne.s32.totalorder %s1510_s30, %s1090_s26  ;;  %p1099_p0 = scmp.lt.s32.totalorder %s1090_s26, %s1090_s26 }
  0x5c   : > { %p1093_p11 = pnand %p1091_p1, %p1079_p4  ;;  %p1100_p8 = por %p1099_p0, %p1098_p5 }
  0x5e   : > { %p1094_p7 = pneg %p1093_p11 }
  0x60   : > { %p1101_p10 = pnand %p1100_p8, %p1094_p7 }
  0x62   : > { %1104 = shalt.err (!%p1101_p10)
}
  0x63   : > { %s1299_s18 = smov 128   ;;  %s1300_s20 = smov 8  }
  0x64   : > { %924 = dma.hbm_to_vmem [thread:$0]  (!%p1516_p2), %s1717_s3, 512, %s1510_s30, [#allocation13], %s1299_s18, %s1299_s18, %s1300_s20  }
  0x65   : > { %s1765_s10 = sand.u32 1, %s1275_s23   ;;  %s1105_s7 = scalar_lea.hbm %s1524_s1, 128 }
  0x66   : > { %s246_s27 = scalar_lea.sflag [#allocation7], %s1765_s10  ;;  %p1106_p8 = scmp.ne.s32.totalorder %s1524_s1, %s1105_s7 }
  0x67   : > { %p1766_p10 = scmp.ne.s32.totalorder %s1757_s14, 0  ;;  %s1110_s12 = scalar_lea.hbm %s1714_s0, 1024 }
  0x68   : > { %p1111_p7 = scmp.lt.u32.totalorder %s1524_s1, %s1714_s0  ;;  %p1112_p11 = scmp.lt.u32.totalorder %s1110_s12, %s1105_s7 }
  0x69   : > { %p1108_p1 = pnand %p1106_p8, %p1766_p10  ;;  %p1114_p3 = scmp.lt.u32.totalorder %s1105_s7, %s1524_s1 }
  0x6a   : > { %p1113_p0 = por %p1112_p11, %p1111_p7 }
  0x6b   : > { %p1109_p5 = pneg %p1108_p1 }
  0x6c   : > { %p1115_p4 = por %p1114_p3, %p1113_p0 }
  0x6e   : > { %p1116_p2 = pnand %p1115_p4, %p1109_p5 }
  0x70   : > { %1119 = shalt.err (!%p1116_p2)
}
  0x71   : > { %s1120_s30 = scalar_lea.vmem %s1527_s17, 128  ;;  %s1301_s28 = smov [#allocation6]  }
  0x72   : > { %p1121_p6 = scmp.ne.s32.totalorder %s1527_s17, %s1120_s30  ;;  %s1125_s15 = sshll.u32 %s1301_s28, 4  ;;  %s1126_s15 = int_to_ptr.vmem [resolvable:$false] %s1125_s15 }
  0x73   : > { %s1127_s4 = scalar_lea.vmem %s1126_s15, 256  ;;  %p1128_p12 = scmp.lt.s32.totalorder %s1527_s17, %s1126_s15 }
  0x74   : > { %p1123_p9 = pnand %p1121_p6, %p1766_p10  ;;  %p1129_p8 = scmp.lt.s32.totalorder %s1127_s4, %s1120_s30 }
  0x76   : > { %p1124_p13 = pneg %p1123_p9  ;;  %p1130_p1 = por %p1129_p8, %p1128_p12 }
  0x78   : > { %p1131_p7 = pnand %p1130_p1, %p1124_p13 }
  0x7a   : > { %1134 = shalt.err (!%p1131_p7)
}
  0x7b   : > { %p1767_p5 = scmp.ne.s32.totalorder %s1755_s5, 0  ;;  %s1577_s18 = scalar_lea.hbm %s1716_s2, %s1428_s29 }
  0x7c   : > { %s291_s20 = scalar_lea.vmem [#allocation11], %s1419_s13  ;;  %s1135_s21 = scalar_lea.hbm %s1577_s18, 128 }
  0x7d   : > { %928 = dma.hbm_to_vmem [thread:$0]  (!%p1767_p5), %s1524_s1, 128, %s1527_s17, %s246_s27  }
  0x7e   : > { %s301_s16 = sshll.u32 %s291_s20, 4  ;;  %p1136_p11 = scmp.ne.s32.totalorder %s1577_s18, %s1135_s21  ;;  %s302_s16 = int_to_ptr.vmem [resolvable:$true] %s301_s16 }
  0x7f   : > { %s1140_s1 = scalar_lea.hbm %s1716_s2, 1024  ;;  %p1141_p4 = scmp.lt.u32.totalorder %s1577_s18, %s1716_s2 }
  0x80   : > { %p1138_p0 = pnand %p1136_p11, %p1766_p10  ;;  %p1142_p2 = scmp.lt.u32.totalorder %s1140_s1, %s1135_s21 }
  0x81   : > { %p1144_p9 = scmp.lt.u32.totalorder %s1135_s21, %s1577_s18 }
  0x82   : > { %p1139_p3 = pneg %p1138_p0  ;;  %p1143_p6 = por %p1142_p2, %p1141_p4 }
  0x84   : > { %p1145_p13 = por %p1144_p9, %p1143_p6 }
  0x86   : > { %p1146_p12 = pnand %p1145_p13, %p1139_p3 }
  0x88   : > { %1149 = shalt.err (!%p1146_p12)
}
  0x89   : > { %s1150_s29 = scalar_lea.vmem %s302_s16, 128  ;;  %s1302_s13 = smov [#allocation11]  }
  0x8a   : > { %p1151_p8 = scmp.ne.s32.totalorder %s302_s16, %s1150_s29  ;;  %s1155_s26 = sshll.u32 %s1302_s13, 4  ;;  %s1156_s26 = int_to_ptr.vmem [resolvable:$false] %s1155_s26 }
  0x8b   : > { %s1157_s30 = scalar_lea.vmem %s1156_s26, 256  ;;  %p1158_p11 = scmp.lt.s32.totalorder %s302_s16, %s1156_s26 }
  0x8c   : > { %p1153_p1 = pnand %p1151_p8, %p1766_p10  ;;  %p1159_p0 = scmp.lt.s32.totalorder %s1157_s30, %s1150_s29 }
  0x8e   : > { %p1154_p7 = pneg %p1153_p1  ;;  %p1160_p5 = por %p1159_p0, %p1158_p11 }
  0x90   : > { %p1161_p2 = pnand %p1160_p5, %p1154_p7 }
  0x92   : > { %1164 = shalt.err (!%p1161_p2)
}
  0x93   : > { %p1768_p4 = scmp.ne.s32.totalorder %s1755_s5, 0  ;;  %p1769_p3 = scmp.ne.s32.totalorder %s1763_s9, 0 }
  0x94   : > { %s312_s14 = sand.u32 (!%p1769_p3), 1, %s1271_s22   ;;  %p1770_p10 = scmp.ne.s32.totalorder (!%p1769_p3), %s1758_s6, 0 }
  0x95   : > { %934 = dma.hbm_to_vmem [thread:$0]  (!%p1768_p4), %s1577_s18, 128, %s302_s16, %s1448_s8  }
  0x96   : > { %310 = sbr.rel (%p1769_p3) target bundleno = 1226 (0x4ca), region = 40  ;;  %s1601_s28 = sshll.u32 (!%p1769_p3), %s312_s14, 3 }
  0x97   : > { %s313_s15 = scalar_lea.sflag (!%p1769_p3), [#allocation7], %s312_s14  ;;  %s316_s4 = scalar_lea.vmem (!%p1769_p3), [#allocation6], %s1601_s28 }
  0x9d   : > { %1238 = dma.done.wait (%p1770_p10), %s313_s15, 128  }
  0x9e   : > { %1240 = vsyncadd (%p1770_p10), %s313_s15, 4294967168  ;;  %s321_s5 = sand.u32 1, %s1479_s11   ;;  %s325_s9 = scalar_lea.vmem [#allocation9], %s1601_s28 }
  0x9f   : > { %s322_s8 = scalar_lea.sflag [#allocation10], %s321_s5 }
  0xa0   : > { %1242 = dma.done.wait (%p1770_p10), %s322_s8, 256  }
  0xa1   : > { %1244 = vsyncadd (%p1770_p10), %s322_s8, 4294967040  ;;  %s334_s25 = scalar_lea.vmem [#allocation11], %s1601_s28  ;;  %p1771_p5 = scmp.eq.s32.totalorder %s1479_s11, 0 }
  0xa3   : > { %1246 = dma.done.wait (%p1771_p5), [#allocation13], 512   ;;  %p1772_p6 = pmov %p1771_p5 }
  0xa4   : > { %s372_s12 = sand.u32 1, %s1259_s19   ;;  %p375_p9 = scmp.eq.s32.totalorder %s1279_s24, 0 }
  0xa5   : > { %1248 = vsyncadd (%p1772_p6), [#allocation13], 4294966784  ;;  %s1623_s18 = sshll.u32 %s372_s12, 3  ;;  %vm381_vm0 = vcmask (%p375_p9), 261120   ;;  %v1303_v0 = vmov (%p375_p9), 0.0  }
  0xa6   : > { %s374_s20 = scalar_lea.vmem [#allocation14], %s1623_s18  ;;  %380 = sbr.rel (!%p375_p9) target bundleno = 173 (0xad), region = 60  ;;  %382 = vst.msk [vmem:[#allocation2] sm:$0xff] (%p375_p9), %vm381_vm0, %v1303_v0 }
  0xad PF: > { %vm389_vm1 = vcmask 64512   ;;  %v392_v1 = vld [vmem:[%s325_s9] sm:$0xff]  ;;  %v1304_v2 = vmov 0.0   ;;  %vm1305_vm2 = vmmov 0   ;;  %v391_v3 = vld [vmem:[%s316_s4] sm:$0xff]  ;;  %vm386_vm3 = vcmask 7168  }
  0xae   : > { %894 = vmatprep.subr.mxu0 %v1304_v2  ;;  %390 = vst.msk [vmem:[#allocation5] sm:$0xff] %vm389_vm1, %v1304_v2  ;;  %896 = vmatprep.mubr.msk.f32.mxu0 %vm1305_vm2, %v1304_v2  ;;  %v1306_v8 = vmov -inf   ;;  %v1307_v9 = vmov 0   ;;  %v393_v14 = vld [vmem:[%s334_s25] sm:$0xff]  ;;  %s878_s11 = sshll.u32 %s1279_s24, 3  ;;  %p671_p13 = scmp.eq.s32.totalorder %s1279_s24, 3 }
  0xaf   : > { %895 = vmatpush3.xpose.msk.msra.mxu0 %vm389_vm1, %v392_v1  ;;  %899 = vmatprep.subr.mxu1 %v1304_v2  ;;  %387 = vst.msk [vmem:[#allocation3] sm:$0xff] %vm386_vm3, %v1306_v8  ;;  %388 = vst.msk [vmem:[#allocation4] sm:$0xff] %vm386_vm3, %v1304_v2  ;;  %s593_s6 = scalar_lea.vmem [#allocation12], %s878_s11  ;;  %v591_v38 = vld [vmem:[#allocation2] sm:$0xff]  ;;  %vm669_vm4 = vcmask 261120   ;;  %s1773_s10 = sld [smem:[#allocation32_spill]] (%p671_p13) }
  0xb0   : > { %901 = vmatprep.mubr.msk.f32.mxu1 %vm1305_vm2, %v1304_v2  ;;  %1039 = vset.pattern.permute.xlu0 %v1307_v9  ;;  %v594_v22 = vld [vmem:[%s593_s6] sm:$0xff] }
  0xb1   : > { %1040 = vset.pattern.permute.xlu1 %v1307_v9  ;;  %900 = vmatpush3.msra.mxu1 %v393_v14 }
  0xb2   : > { %897 = vmatmul.mubr.msk.f32.vlgmr.msra.gmra.mrb[0].mxu0 %vm389_vm1, %v391_v3  ;;  %904 = vmatprep.subr.mxu1 %v1304_v2 }
  0xb5   : > { %v496_v29 = vld [vmem:[#allocation5] sm:$0xff]  ;;  %v881_v43 = vld [vmem:[%s1773_s10] ss:$0 sm:$0xff] (%p671_p13) }
  0xb6   : > { %v472_v10 = vld [vmem:[#allocation3] sm:$0xff]  ;;  %v488_v23 = vld [vmem:[#allocation4] sm:$0xff] }
 0x185   : > { %v467_v4 = vpop.f32.mrb[0].mxu0 }
 0x186   : > { %v471_v5 = vmul.f32 0.35355338, %v467_v4  ;;  %v898_v6 = vpop.f32.mrb[1].mxu0 }
 0x188   : > { %v473_v7 = vsel %vm389_vm1, %v471_v5, -inf }
 0x189   : > { %474 = vmax.xlane.f32.xlu0 %v473_v7 }
 0x216   : > { %v475_v11 = vpop.xlane.xlu0 %474 }
 0x217   : > { %v476_v12 = vmax.f32 %v472_v10, %v475_v11 }
 0x219   : > { %v477_v13 = vsub.f32 %v472_v10, %v476_v12  ;;  %578 = vst.msk [vmem:[#allocation3] sm:$0xff] %vm386_vm3, %v476_v12  ;;  %482 = vperm.xlu0 %1039, %v476_v12  }
 0x21b   : > { %v478_v20 = vmul.f32 1.442695, %v477_v13 }
 0x298   : > { %v483_v15 = vpop.permute.xlu0 %482 }
 0x299   : > { %v485_v16 = vsub.f32 %v471_v5, %v483_v15 }
 0x29b   : > { %v486_v17 = vmul.f32 1.442695, %v485_v16 }
 0x29d   : > { %1041 = vpow2.f32 %v486_v17 }
 0x29e   : > { %1043 = vpow2.f32 %v478_v20 }
 0x2a7   : > { %v1042_v18 = vpop.eup %1041 }
 0x2a8   : > { %902 = vmatmul.mubr.msk.f32.vlgmr.msra.gmra.mrb[0].mxu1 %vm389_vm1, %v1042_v18  ;;  %v490_v19 = vsel %vm389_vm1, %v1042_v18, 0.0  ;;  %v1044_v21 = vpop.eup %1043 }
 0x2a9   : > { %491 = vadd.xlane.f32.xlu1 %v490_v19  ;;  %906 = vmatprep.mubr.msk.f32.mxu1 %vm1305_vm2, %v1304_v2  ;;  %v489_v24 = vmul.f32 %v1044_v21, %v488_v23 }
 0x2aa   : > { %905 = vmatpush3.msra.mxu1 %v594_v22 }
 0x2ba   : > { %499 = vperm.xlu1 %1040, %v1044_v21  }
 0x336   : > { %v492_v25 = vpop.xlane.xlu1 %491 }
 0x337   : > { %v493_v26 = vadd.f32 %v492_v25, %v489_v24 }
 0x339   : > { %495 = vst.msk [vmem:[#allocation4] sm:$0xff] %vm386_vm3, %v493_v26 }
 0x33a   : > { %v500_v30 = vpop.permute.xlu1 %499 }
 0x33b   : > { %v502_v31 = vmul.f32 %v500_v30, %v496_v29 }
 0x340   : > { %v583_v27 = vld [vmem:[#allocation4] sm:$0xff] }
 0x341   : > { %1045 = vrcp.f32 %v583_v27 }
 0x34b   : > { %v1046_v28 = vpop.eup %1045 }
 0x34c   : > { %587 = vperm.xlu1 %1040, %v1046_v28  }
 0x37b   : > { %v572_v32 = vpop.f32.mrb[0].mxu1 }
 0x37c   : > { %v576_v33 = vadd.f32 %v572_v32, %v502_v31  ;;  %v903_v34 = vpop.f32.mrb[1].mxu1 }
 0x37e   : > { %577 = vst.msk [vmem:[#allocation5] sm:$0xff] %vm389_vm1, %v576_v33 }
 0x385   : > { %v582_v35 = vld [vmem:[#allocation5] sm:$0xff] }
 0x3cb   : > { %v588_v36 = vpop.permute.xlu1 %587 }
 0x3cc   : > { %v590_v37 = vmul.f32 %v588_v36, %v582_v35 }
 0x3ce   : > { %907 = vmatmul.mubr.msk.f32.vlgmr.msra.gmra.mrb[2].mxu1 %vm389_vm1, %v590_v37 }
 0x49e   : > { %675 = sbr.rel (!%p671_p13) target bundleno = 1199 (0x4af), region = 72 }
 0x4a1   : > { %v664_v39 = vpop.f32.mrb[2].mxu1 }
 0x4a2   : > { %v668_v40 = vadd.f32 %v664_v39, %v591_v38  ;;  %v908_v41 = vpop.f32.mrb[3].mxu1 }
 0x4a4   : > { %670 = vst.msk [vmem:[#allocation2] sm:$0xff] %vm669_vm4, %v668_v40 }
 0x4ab   : > { %v676_v42 = vld [vmem:[#allocation2] sm:$0xff] }
 0x4ac   : > { %v684_v44 = vadd.f32 %v881_v43, %v676_v42 }
 0x4ae   : > { %686 = vst.msk [vmem:[%s374_s20] sm:$0xff] %vm669_vm4, %v684_v44 }
 0x4af PF: > { %s1774_s7 = sld [smem:[#allocation21_spill]]  ;;  %s1775_s24 = sld [smem:[#allocation29_spill]] }
 0x4b0   : > { %s1776_s29 = sld [smem:[#allocation33_spill]]  ;;  %s702_s26 = sshll.u32 %s374_s20, 4  ;;  %s703_s26 = int_to_ptr.vmem [resolvable:$true] %s702_s26 }
 0x4b1   : > { %s688_s30 = scalar_lea.sflag [#allocation8], %s372_s12  ;;  %s1165_s14 = scalar_lea.vmem %s703_s26, 128 }
 0x4b2   : > { %p1166_p12 = scmp.ne.s32.totalorder %s703_s26, %s1165_s14  ;;  %s1308_s28 = smov [#allocation14]  }
 0x4b3   : > { %s1169_s15 = sshll.u32 %s1308_s28, 4  ;;  %s1170_s15 = int_to_ptr.vmem [resolvable:$false] %s1169_s15 }
 0x4b4   : > { %s1171_s4 = scalar_lea.vmem %s1170_s15, 256  ;;  %p1172_p11 = scmp.lt.s32.totalorder %s703_s26, %s1170_s15 }
 0x4b5   : > { %s883_s1 = sshll.u32 %s1774_s7, 7  ;;  %p1777_p8 = scmp.ne.s32.totalorder %s1775_s24, 0 }
 0x4b6   : > { %s1654_s13 = scalar_lea.hbm %s1776_s29, %s883_s1  ;;  %p1173_p0 = scmp.lt.s32.totalorder %s1171_s4, %s1165_s14 }
 0x4b7   : > { %p1167_p1 = pnand %p1166_p12, %p1777_p8 }
 0x4b8   : > { %p1174_p2 = por %p1173_p0, %p1172_p11 }
 0x4b9   : > { %p1168_p7 = pneg %p1167_p1 }
 0x4bb   : > { %p1175_p4 = pnand %p1174_p2, %p1168_p7 }
 0x4bd   : > { %1178 = shalt.err (!%p1175_p4)
}
 0x4be   : > { %s1179_s5 = scalar_lea.hbm %s1654_s13, 128  ;;  %s1183_s25 = scalar_lea.hbm %s1776_s29, 256 }
 0x4bf   : > { %p1180_p3 = scmp.ne.s32.totalorder %s1654_s13, %s1179_s5  ;;  %p1184_p6 = scmp.lt.u32.totalorder %s1654_s13, %s1776_s29 }
 0x4c0   : > { %p1185_p9 = scmp.lt.u32.totalorder %s1183_s25, %s1179_s5  ;;  %p1187_p12 = scmp.lt.u32.totalorder %s1179_s5, %s1654_s13 }
 0x4c1   : > { %p1181_p10 = pnand %p1180_p3, %p1777_p8 }
 0x4c2   : > { %p1186_p13 = por %p1185_p9, %p1184_p6 }
 0x4c3   : > { %p1182_p5 = pneg %p1181_p10 }
 0x4c4   : > { %p1188_p1 = por %p1187_p12, %p1186_p13 }
 0x4c6   : > { %p1189_p7 = pnand %p1188_p1, %p1182_p5 }
 0x4c8   : > { %1192 = shalt.err (!%p1189_p7)
}
 0x4c9   : > { %919 = dma.vmem_to_hbm [thread:$0]  (%p1777_p8), %s703_s26, 128, %s1654_s13, %s688_s30  }
 0x4ca PF: > { %s1778_s20 = sld [smem:[#allocation24_spill]]  ;;  %s1779_s11 = sld [smem:[#allocation19_spill]] }
 0x4cb   : > { %s1780_s6 = sld [smem:[#allocation30_spill]] }
 0x4d0   : > { %p942_p11 = scmp.ge.s32.totalorder %s1778_s20, 2  ;;  %s714_s16 = sand.u32 1, %s1779_s11  }
 0x4d1   : > { %p1781_p0 = scmp.ne.s32.totalorder %s1780_s6, 0  ;;  %s715_s21 = scalar_lea.sflag [#allocation8], %s714_s16 }
 0x4d3   : > { %p936_p2 = pnand %p942_p11, %p1781_p0 }
 0x4d5   : > { %1250 = dma.done.wait (!%p936_p2), %s715_s21, 128  }
 0x4d6   : > { %1252 = vsyncadd (!%p936_p2), %s715_s21, 4294967168  ;;  %s25_s28 = sadd.s32 1, %s1778_s20   ;;  %s1782_s10 = sld [smem:[#allocation20_spill]] }
 0x4d7   : > { %p22_p4 = scmp.ge.s32.totalorder %s25_s28, 10   ;;  %s1783_s20 = sld [smem:[#allocation27_spill]] }
 0x4d8   : > { %s1784_s7 = sld [smem:[#allocation28_spill]]  ;;  %s1785_s24 = sld [smem:[#allocation22_spill]] }
 0x4d9   : > { %s1786_s25 = sld [smem:[#allocation23_spill]]  ;;  %s1787_s26 = sld [smem:[#allocation25_spill]] }
 0x4da   : > { %s1788_s27 = sld [smem:[#allocation26_spill]]  ;;  %s1789_s18 = smov %s1259_s19 }
 0x4db   : > { %s1791_s21 = smov %s1271_s22  ;;  %s1792_s22 = smov %s1275_s23 }
 0x4dc   : > { %s1790_s19 = smov %s1782_s10  ;;  %24 = sbr.rel (!%p22_p4) target bundleno = 16 (0x10), region = 130 }
 0x4de   : > { %s1793_s23 = smov %s1784_s7 }
 0x4e3   :  { %720 = vsyncpa [#allocation7], 1 }
 0x4e4   :  { %722 = vsyncpa [#allocation7 + $0x1], 1 }
 0x4e5   :  { %723 = vsyncpa [#allocation10], 1 }
 0x4e6   :  { %725 = vsyncpa [#allocation10 + $0x1], 1 }
 0x4e7   :  { %726 = vsyncpa [#allocation13], 1 }
 0x4e8   :  { %727 = vsyncpa [#allocation8], 1 }
 0x4e9   :  { %729 = vsyncpa [#allocation8 + $0x1], 1 }

</bundles_post_ra>
